<compile_context>
chip_gen: v5e
topology: v5e:2x2
jax: 0.10.0
libtpu: 0.0.40
codegen_flags: <defaults>
</compile_context>

<pallas_src>
import functools

import jax
import jax.numpy as jnp
from jax.experimental import pallas as pl
from jax.experimental.pallas import tpu as pltpu


def _round_up(a: int, b: int) -> int:
    return (a + b - 1) // b * b


def _vmem_capacity_bytes() -> int:
    """Per-generation VMEM capacity; conservative fallback if unqueryable."""
    try:
        info = pltpu.get_tpu_info()
        cap = getattr(info, "vmem_capacity_bytes", None)
        if cap:
            return int(cap)
    except Exception:
        pass
    return 64 * 2**20  # v7x physical size (smallest of the targeted gens)


def _choose_tile(dim: int, req: int, align: int) -> int:
    """Largest tile <= req that equals dim or divides dim while being a
    multiple of `align`; falls back to an aligned tile (padding needed)."""
    if dim <= req:
        return dim
    t = (req // align) * align
    while t >= align:
        if dim % t == 0:
            return t
        t -= align
    return max(align, (req // align) * align)


def prepare_final_linear_params(w, b, *, operand_dtype=jnp.bfloat16):
    """One-time parameter prep (call at init, NOT per forward).

    PyTorch weight (vocab, d_model) -> pre-transposed (d_model, vocab) in the
    MXU operand dtype; bias -> (1, vocab) f32 for the in-kernel f32 add.
    """
    w_t = jnp.asarray(w).T.astype(operand_dtype)
    b2d = jnp.asarray(b).reshape(1, -1).astype(jnp.float32)
    return w_t, b2d


def _final_linear_kernel(x_ref, w_ref, b_ref, o_ref):
    """x_ref:(tm,K) opd, w_ref:(K,tn) opd, b_ref:(1,tn) f32, o_ref:(tm,tn).

    Full-K tile: one MXU matmul per output tile, bias added in f32, single
    lane-dense store. No scratch accumulator, no reduction axis."""
    o_ref[...] = (
        jnp.dot(x_ref[...], w_ref[...], preferred_element_type=jnp.float32)
        + b_ref[...]
    ).astype(o_ref.dtype)


@functools.partial(
    jax.jit,
    static_argnames=(
        "tm", "tn", "mp", "npad", "out_dtype", "vocab_outer", "vmem_limit",
        "operand_dtype",
    ),
)
def _final_linear_impl(x, w_t, b2d, *, tm, tn, mp, npad, out_dtype,
                       vocab_outer, vmem_limit, operand_dtype):
    batch, seq, K = x.shape
    _, N = w_t.shape
    M = batch * seq

    # Activation cast is cheap (x is the small operand); the weight arrives
    # already in operand dtype from prepare_final_linear_params.
    x2d = x.reshape(M, K).astype(operand_dtype)
    if mp != M:
        x2d = jnp.pad(x2d, ((0, mp - M), (0, 0)))
    if npad != N:
        # Rare slow path: only if no tile divides vocab. Prefer padding the
        # weight once at prep time instead.
        w_t = jnp.pad(w_t, ((0, 0), (0, npad - N)))
        b2d = jnp.pad(b2d, ((0, 0), (0, npad - N)))

    opd_bytes = jnp.dtype(operand_dtype).itemsize
    out_bytes = jnp.dtype(out_dtype).itemsize

    if vocab_outer:
        # Vocab axis outermost: each weight tile (0, j) is DMA'd exactly once;
        # the (small) x strip is re-streamed once per outer step.
        grid = (npad // tn, mp // tm)
        x_spec = pl.BlockSpec((tm, K), lambda j, i: (i, 0))
        w_spec = pl.BlockSpec((K, tn), lambda j, i: (0, j))
        b_spec = pl.BlockSpec((1, tn), lambda j, i: (0, j))
        o_spec = pl.BlockSpec((tm, tn), lambda j, i: (i, j))
        bytes_accessed = (
            K * npad * opd_bytes                      # weight: streamed once
            + (npad // tn) * mp * K * opd_bytes       # x: once per outer step
            + npad * 4                                # bias
            + mp * npad * out_bytes                   # output: written once
        )
    else:
        # x larger than the weight: keep x resident, stream W per outer step.
        grid = (mp // tm, npad // tn)
        x_spec = pl.BlockSpec((tm, K), lambda i, j: (i, 0))
        w_spec = pl.BlockSpec((K, tn), lambda i, j: (0, j))
        b_spec = pl.BlockSpec((1, tn), lambda i, j: (0, j))
        o_spec = pl.BlockSpec((tm, tn), lambda i, j: (i, j))
        bytes_accessed = (
            mp * K * opd_bytes
            + (mp // tm) * K * npad * opd_bytes
            + npad * 4
            + mp * npad * out_bytes
        )

    cost = pl.CostEstimate(
        flops=2 * mp * K * npad,
        transcendentals=0,
        bytes_accessed=bytes_accessed,
    )

    out2d = pl.pallas_call(
        _final_linear_kernel,
        out_shape=jax.ShapeDtypeStruct((mp, npad), out_dtype),
        grid_spec=pltpu.PrefetchScalarGridSpec(
            num_scalar_prefetch=0,
            grid=grid,
            in_specs=[x_spec, w_spec, b_spec],
            out_specs=o_spec,
        ),
        compiler_params=pltpu.CompilerParams(
            dimension_semantics=("parallel", "parallel"),
            vmem_limit_bytes=vmem_limit,
        ),
        cost_estimate=cost,
    )(x2d, w_t, b2d)

    if (mp, npad) != (M, N):
        out2d = out2d[:M, :N]
    return out2d.reshape(batch, seq, N)


def final_linear(x, w_t, b, *, tm=512, tn=1024, out_dtype=None,
                 operand_dtype=jnp.bfloat16):
    """Forward pass of FinalLinear.

    x: (batch, seq, d_model)
    w_t: (d_model, vocab) pre-transposed & pre-cast (prepare_final_linear_params)
    b: (vocab,) or (1, vocab)
    """
    batch, seq, d_model = x.shape
    K, N = w_t.shape
    assert K == d_model, (K, d_model)
    M = batch * seq
    out_dtype = jnp.dtype(out_dtype if out_dtype is not None else x.dtype)
    operand_dtype = jnp.dtype(operand_dtype)

    if w_t.dtype != operand_dtype:
        # TODO(synk): callers should pre-cast once via prepare_final_linear_params;
        # this fallback re-casts the full weight per call (slow).
        w_t = w_t.astype(operand_dtype)
    b2d = jnp.asarray(b, dtype=jnp.float32).reshape(1, N)

    opd_bytes = operand_dtype.itemsize
    out_bytes = out_dtype.itemsize

    # ---- Tile planning (static, Python level; generation-aware VMEM budget) ----
    vmem_cap = _vmem_capacity_bytes()
    tile_budget = int(0.62 * vmem_cap)   # room for double-buffered working set

    tm_t = _choose_tile(M, tm, 8)        # sublane-aligned (or full dim)
    tn_t = _choose_tile(N, tn, 128)      # lane-aligned (or full dim)
    while True:
        tile_bytes = 2 * (
            tm_t * K * opd_bytes          # x tile (double-buffered)
            + K * tn_t * opd_bytes        # weight tile
            + tm_t * tn_t * out_bytes     # output tile
            + tn_t * 4                    # bias tile
        )
        if tile_bytes <= tile_budget:
            break
        w_side = K * tn_t * opd_bytes + tm_t * tn_t * out_bytes
        x_side = tm_t * K * opd_bytes
        if tn_t > 128 and (w_side >= x_side or tm_t <= 8):
            tn_t = _choose_tile(N, max(128, tn_t // 2), 128)
        elif tm_t > 8:
            tm_t = _choose_tile(M, max(8, tm_t // 2), 8)
        else:
            break  # TODO(synk): absurdly large d_model would need a K-split path
    mp = _round_up(M, tm_t)
    npad = _round_up(N, tn_t)

    vmem_limit = int(min(int(0.82 * vmem_cap),
                         max(24 * 2**20, int(tile_bytes * 1.3))))

    # Stream the larger operand exactly once (LM head: usually the weight).
    vocab_outer = (K * N) >= (M * K)

    return _final_linear_impl(
        x, w_t, b2d,
        tm=tm_t, tn=tn_t, mp=mp, npad=npad,
        out_dtype=out_dtype, vocab_outer=vocab_outer,
        vmem_limit=vmem_limit, operand_dtype=operand_dtype,
    )


if __name__ == "__main__":
    # Small shapes consistent with the module.
    batch, seq, d_model, vocab = 2, 8, 32, 128

    key = jax.random.PRNGKey(0)
    kx, kw, kb = jax.random.split(key, 3)

    x = jax.random.normal(kx, (batch, seq, d_model), dtype=jnp.float32)
    bound = 1.0 / (d_model ** 0.5)
    # PyTorch nn.Linear layout: (out_features, in_features), uniform init.
    w = jax.random.uniform(kw, (vocab, d_model), minval=-bound, maxval=bound,
                           dtype=jnp.float32)
    b = jax.random.uniform(kb, (vocab,), minval=-bound, maxval=bound,
                           dtype=jnp.float32)

    # One-time parameter prep: transpose + cast, kept OFF the per-call path.
    w_t, b2d = prepare_final_linear_params(w, b, operand_dtype=jnp.bfloat16)

    out = final_linear(x, w_t, b2d)
    jax.block_until_ready(out)

    # Reference with matching operand precision (bf16 operands, f32 accumulate).
    x_bf = x.astype(jnp.bfloat16).astype(jnp.float32)
    w_bf = w_t.astype(jnp.float32)
    ref = (
        jnp.einsum("bsd,dv->bsv", x_bf, w_bf,
                   precision=jax.lax.Precision.HIGHEST)
        + b
    )

    assert out.shape == (batch, seq, vocab), out.shape
    assert out.dtype == x.dtype, out.dtype
    assert jnp.allclose(out, ref, atol=2e-3, rtol=2e-3), (
        float(jnp.max(jnp.abs(out - ref)))
    )

    print("KERNEL_OK")
</pallas_src>

<mosaic_0001>
module attributes {stable_mosaic.version = 11 : i64} {
  func.func @_final_linear_kernel(%arg0: i32, %arg1: i32, %arg2: memref<16x32xbf16, #tpu.memory_space<vmem>>, %arg3: memref<32x128xbf16, #tpu.memory_space<vmem>>, %arg4: memref<1x128xf32, #tpu.memory_space<vmem>>, %arg5: memref<16x128xf32, #tpu.memory_space<vmem>>) attributes {dimension_semantics = [#tpu.dimension_semantics<parallel>, #tpu.dimension_semantics<parallel>], iteration_bounds = array<i64: 1, 1>, scalar_prefetch = 0 : i64, scratch_operands = 0 : i64, tpu.core_type = #tpu.core_type<tc>, window_params = [{transform_indices = @transform_0, window_bounds = array<i64: 16, 32>}, {transform_indices = @transform_1, window_bounds = array<i64: 32, 128>}, {transform_indices = @transform_2, window_bounds = array<i64: 1, 128>}, {transform_indices = @transform_3, window_bounds = array<i64: 16, 128>}]} {
    %c0 = arith.constant 0 : index
    %c0_0 = arith.constant 0 : index
    %0 = vector.load %arg2[%c0, %c0_0] : memref<16x32xbf16, #tpu.memory_space<vmem>>, vector<16x32xbf16>
    %c0_1 = arith.constant 0 : index
    %c0_2 = arith.constant 0 : index
    %1 = vector.load %arg3[%c0_1, %c0_2] : memref<32x128xbf16, #tpu.memory_space<vmem>>, vector<32x128xbf16>
    %cst = arith.constant dense<0.000000e+00> : vector<16x128xf32>
    %2 = tpu.matmul %0, %1, %cst {dimension_numbers = #tpu.dot_dimension_numbers<[1], [0], [0], [1], [0, 0, 1, 1], [], []>} : vector<16x32xbf16>, vector<32x128xbf16>, vector<16x128xf32> -> vector<16x128xf32>
    %c0_3 = arith.constant 0 : index
    %c0_4 = arith.constant 0 : index
    %3 = vector.load %arg4[%c0_3, %c0_4] : memref<1x128xf32, #tpu.memory_space<vmem>>, vector<1x128xf32>
    %4 = vector.broadcast %3 : vector<1x128xf32> to vector<16x128xf32>
    %5 = arith.addf %2, %4 : vector<16x128xf32>
    %c0_5 = arith.constant 0 : index
    %c0_6 = arith.constant 0 : index
    %6 = vector.load %arg5[%c0_5, %c0_6] : memref<16x128xf32, #tpu.memory_space<vmem>>, vector<16x128xf32>
    tpu.vector_store %arg5[%c0_5, %c0_6], %5 {strides = array<i32>} : memref<16x128xf32, #tpu.memory_space<vmem>>, vector<16x128xf32>,
    return
  }
  func.func @transform_0(%arg0: i32, %arg1: i32) -> (i32, i32) {
    %c0_i32 = arith.constant 0 : i32
    %c0_i32_0 = arith.constant 0 : i32
    return %arg1, %c0_i32 : i32, i32
  }
  func.func @transform_1(%arg0: i32, %arg1: i32) -> (i32, i32) {
    %c0_i32 = arith.constant 0 : i32
    %c0_i32_0 = arith.constant 0 : i32
    return %c0_i32, %arg0 : i32, i32
  }
  func.func @transform_2(%arg0: i32, %arg1: i32) -> (i32, i32) {
    %c0_i32 = arith.constant 0 : i32
    %c0_i32_0 = arith.constant 0 : i32
    return %c0_i32, %arg0 : i32, i32
  }
  func.func @transform_3(%arg0: i32, %arg1: i32) -> (i32, i32) {
    %c0_i32 = arith.constant 0 : i32
    return %arg1, %arg0 : i32, i32
  }
}

</mosaic_0001>

<bundles_post_ra>
// kernel: _final_linear_impl.1
= control target key start
LH: loop header
LB: loop body
LE: loop exit
PB: predicated region body
PF: predicated region fallthrough
CT: control target
= control target key end

     0   :  { %s165_s0 = inlined_call_operand.vmem [shape: bf16[16,32], index: 0, kind: input, shape index: {}]   ;;  %s166_s1 = inlined_call_operand.vmem [shape: bf16[32,128], index: 1, kind: input, shape index: {}]   ;;  %s167_s2 = inlined_call_operand.vmem [shape: f32[1,128], index: 2, kind: input, shape index: {}]   ;;  %s168_s3 = inlined_call_operand.hbm [shape: f32[16,128], index: 3, kind: output, shape index: {}]  }
   0x1   :  { %v96_v0 = vld [vmem:[%s166_s1 + $0x8] sm:$0xff] }
   0x2   :  { %8 = vsyncpa [#allocation3], 0  ;;  %53 = vmatpush.bf16.msra.mxu0 %v96_v0  ;;  %v95_v1 = vld [vmem:[%s166_s1] sm:$0xff]  ;;  %vm43_vm0 = vcmask 261120   ;;  %s127_s20 = smov [#allocation2]   ;;  %s69_s1 = sshll.u32 %s168_s3, 4  ;;  %s70_s1 = int_to_ptr.hbm [resolvable:$true] %s69_s1 }
   0x3   :  { %v94_v2 = vld [vmem:[%s165_s0] sm:$0xff]  ;;  %s67_s21 = sshll.u32 %s127_s20, 4  ;;  %s128_s0 = smov 128   ;;  %s68_s21 = int_to_ptr.vmem [resolvable:$true] %s67_s21 }
   0x4   :  { %v100_v3 = vld [vmem:[%s167_s2] ss:$0 sm:$0xff]  ;;  %s129_s24 = smov 8  }
   0x6   :  { %54 = vmatpush.bf16.msra.mxu0 %v95_v1 }
   0x9   :  { %93 = vmatmul.msk.bf16.vlgmr.msra.gmra.mxu0 %vm43_vm0, %v94_v2 }
  0x86   :  { %v56_v4 = vpop.f32.mrf.mxu0 }
  0x87   :  { %v57_v5 = vadd.f32 %v100_v3, %v56_v4 }
  0x89   :  { %61 = vst [vmem:[#allocation2] sm:$0xff] %v57_v5 }
  0x8e   :  { %v58_v6 = vpop.f32.mrf.mxu0 }
  0x8f   :  { %v59_v7 = vadd.f32 %v100_v3, %v58_v6 }
  0x91   :  { %62 = vst [vmem:[#allocation2 + $0x8] sm:$0xff] %v59_v7 }
  0x92   :  { %75 = dma.vmem_to_hbm [thread:$0]  %s68_s21, 256, %s70_s1, [#allocation3], %s128_s0, %s128_s0, %s129_s24  }
  0x93   :  { %125 = dma.done.wait [#allocation3], 256  }
  0x94   :  { %126 = vsyncadd [#allocation3], 4294967040 }
  0x95   :  { %80 = vsyncpa [#allocation3], 1 }

</bundles_post_ra>
